<compile_context>
chip_gen: v7x
topology: tpu7x:2x2x1
jax: 0.10.0
libtpu: 0.0.40
codegen_flags: <defaults>
</compile_context>

<pallas_src>
import functools

import jax
import jax.numpy as jnp
from jax.experimental import pallas as pl
from jax.experimental.pallas import tpu as pltpu

GAMMA = 0.5
ALPHA = 1.0
LANES = 128
MAX_ROW_BLOCK = 4096   # (4096,128) f32 = 2 MiB/block; 2 inputs x 2 bufs + acc ~ 10 MiB


def _cdiv(a, b):
    return -(-a // b)


def _round_up(a, b):
    return _cdiv(a, b) * b


def _num_tensorcores():
    """Best-effort TensorCore-per-chip count; only trusted if CORE_PARALLEL exists."""
    if not hasattr(pltpu, "CORE_PARALLEL"):
        return 1
    try:
        info = pltpu.get_tpu_info()
    except Exception:
        return 1
    for attr in ("num_cores", "num_tensorcores", "tensor_cores_per_chip",
                 "cores_per_chip", "core_count"):
        n = getattr(info, attr, None)
        if isinstance(n, int) and n >= 1:
            return min(int(n), 2)
    return 1


def _focal_bce_kernel(x_ref, t_ref, out_ref, acc_ref, *, gamma, alpha,
                      blocks_per_split, row_block, total_elems, needs_mask,
                      binary_targets):
    i = pl.program_id(1)  # reduction ("arbitrary") axis, innermost / fastest

    @pl.when(i == 0)
    def _():
        acc_ref[...] = jnp.zeros_like(acc_ref)

    x = x_ref[...].astype(jnp.float32)
    t = t_ref[...].astype(jnp.float32)

    # Numerically stable BCE-with-logits (matches torch.nn.BCEWithLogitsLoss):
    #   bce = max(x, 0) - x*t + log1p(exp(-|x|))
    e = jnp.exp(-jnp.abs(x))                           # EUP #1
    bce = jnp.maximum(x, 0.0) - x * t + jnp.log1p(e)   # EUP #2 (log1p)

    # exp(-bce) = exp(x*t - max(x,0)) / (1 + e)  -- reuse e instead of a 2nd exp.
    d = 1.0 + e
    inv = pl.reciprocal(d, approx=True)                # EUP #3 (cheap vrcp)
    inv = inv * (2.0 - d * inv)                        # Newton step on VPU -> ~exact
    if binary_targets:
        # exp(x*t - max(x,0)) is exactly 1 when sign(x) "matches" the 0/1 target,
        # else exp(-|x|) = e.  Exact only for t in {0, 1}.
        num = jnp.where(jnp.logical_xor(x > 0.0, t > 0.5), e, 1.0)
    else:
        num = jnp.exp(x * t - jnp.maximum(x, 0.0))     # soft targets: general form
    base = jnp.maximum(1.000001 - num * inv, 0.0)      # clamp guards sqrt(base)

    # Focal modulation: alpha * base ** gamma  (EUP-friendly special cases)
    if gamma == 0.5:
        mod = jnp.sqrt(base)                           # EUP #4
    elif gamma == 1.0:
        mod = base
    elif gamma == 1.5:
        mod = base * jnp.sqrt(base)
    elif gamma == 2.0:
        mod = base * base
    else:
        mod = jnp.power(base, gamma)

    loss = bce * mod
    if alpha != 1.0:
        loss = loss * alpha

    if needs_mask:
        # Zero padded rows / partially-OOB tail: global flat index >= total_elems.
        s = pl.program_id(0)
        start = (s * blocks_per_split + i) * (row_block * LANES)
        rid = jax.lax.broadcasted_iota(jnp.int32, (row_block, LANES), 0)
        lid = jax.lax.broadcasted_iota(jnp.int32, (row_block, LANES), 1)
        loss = jnp.where(start + rid * LANES + lid < total_elems, loss, 0.0)

    acc_ref[...] += loss                               # cheap per-step VPU adds

    @pl.when(i == pl.num_programs(1) - 1)
    def _():
        # Lane/sublane-dense (8,128) partial sums: the reshape is vreg-aligned
        # (sublane groups of 8), the sum is pure VPU adds, and the store is a
        # full unmasked tile.  The final cross-lane reduce happens in JAX.
        out_ref[...] = acc_ref[...].reshape(row_block // 8, 8, LANES).sum(axis=0)


def _focal_loss_impl(x, target, gamma, alpha, binary_targets):
    total = x.size

    # Flatten (free for contiguous arrays).  Only pad the flat tail if the
    # element count is not a multiple of 128 (rare for NCHW conv maps).
    xf = x.reshape(-1)
    tf = target.reshape(-1)
    rows = _cdiv(total, LANES)
    if rows * LANES != total:
        pad = rows * LANES - total
        xf = jnp.pad(xf, (0, pad))
        tf = jnp.pad(tf, (0, pad))
    x2 = xf.reshape(rows, LANES)
    t2 = tf.reshape(rows, LANES)

    # Block row count: multiple of the sublane tile (8 for f32, 16 for bf16).
    # Blocks may overhang the array (partial last block) -> in-kernel masking.
    sub_align = 16 if jnp.dtype(x2.dtype).itemsize < 4 else 8
    row_block = min(MAX_ROW_BLOCK, _round_up(rows, sub_align))
    blocks = _cdiv(rows, row_block)

    # One split per TensorCore on multi-TC chips (v7x); single-TC chips
    # (v5e/v6e) keep nsplit=1 so no ghost blocks are read or processed.
    num_cores = _num_tensorcores()
    nsplit = num_cores if (num_cores > 1 and blocks >= num_cores) else 1
    blocks_per_split = _cdiv(blocks, nsplit)

    covered = nsplit * blocks_per_split * row_block * LANES
    needs_mask = covered != total

    kernel = functools.partial(
        _focal_bce_kernel, gamma=gamma, alpha=alpha,
        blocks_per_split=blocks_per_split, row_block=row_block,
        total_elems=total, needs_mask=needs_mask, binary_targets=binary_targets)

    last_block = blocks - 1

    def in_map(s, i):
        b = s * blocks_per_split + i
        if nsplit > 1:
            b = jnp.minimum(b, last_block)   # ghost blocks: keep DMA in-bounds
        return (b, 0)

    if nsplit > 1:
        dims = (pltpu.CORE_PARALLEL, pltpu.ARBITRARY)
    else:
        dims = ("arbitrary", "arbitrary")

    partials = pl.pallas_call(
        kernel,
        out_shape=jax.ShapeDtypeStruct((nsplit * 8, LANES), jnp.float32),
        grid_spec=pltpu.PrefetchScalarGridSpec(
            num_scalar_prefetch=0,
            grid=(nsplit, blocks_per_split),
            in_specs=[
                pl.BlockSpec((row_block, LANES), in_map),
                pl.BlockSpec((row_block, LANES), in_map),
            ],
            out_specs=pl.BlockSpec((8, LANES), lambda s, i: (s, 0)),
            scratch_shapes=[pltpu.VMEM((row_block, LANES), jnp.float32)],
        ),
        compiler_params=pltpu.CompilerParams(
            dimension_semantics=dims,
            vmem_limit_bytes=32 * 1024 * 1024,
        ),
    )(x2, t2)

    # reduction == 'mean' (masked / padded elements contributed exactly 0).
    return jnp.sum(partials) / jnp.float32(total)


@functools.partial(jax.jit, static_argnames=("gamma", "alpha", "binary_targets"))
def focal_loss(x, target, gamma=GAMMA, alpha=ALPHA, binary_targets=True):
    """x, target: same shape (e.g. NCHW), f32 or bf16. Returns scalar f32."""
    return _focal_loss_impl(x, target, gamma, alpha, binary_targets)


def focal_loss_ref(x, target, gamma=GAMMA, alpha=ALPHA):
    x = x.astype(jnp.float32)
    t = target.astype(jnp.float32)
    bce = jnp.maximum(x, 0.0) - x * t + jnp.log1p(jnp.exp(-jnp.abs(x)))
    loss = bce * (alpha * jnp.power(1.000001 - jnp.exp(-bce), gamma))
    return jnp.mean(loss)


if __name__ == "__main__":
    key = jax.random.PRNGKey(0)
    k1, k2 = jax.random.split(key)
    # NCHW logits and binary targets, as fed to BCEWithLogitsLoss in YOLOv3.
    x = jax.random.normal(k1, (2, 4, 16, 16), dtype=jnp.float32)
    tgt = (jax.random.uniform(k2, (2, 4, 16, 16)) > 0.5).astype(jnp.float32)

    out = jax.block_until_ready(focal_loss(x, tgt))
    ref = focal_loss_ref(x, tgt)
    assert jnp.allclose(out, ref, rtol=1e-5, atol=1e-6), (out, ref)

    print("KERNEL_OK")
</pallas_src>

<mosaic_0001>
module attributes {stable_mosaic.version = 11 : i64} {
  func.func @_focal_bce_kernel(%arg0: i32, %arg1: i32, %arg2: memref<16x128xf32, #tpu.memory_space<vmem>>, %arg3: memref<16x128xf32, #tpu.memory_space<vmem>>, %arg4: memref<8x128xf32, #tpu.memory_space<vmem>>, %arg5: memref<16x128xf32, #tpu.memory_space<vmem>>) attributes {dimension_semantics = [#tpu.dimension_semantics<arbitrary>, #tpu.dimension_semantics<arbitrary>], iteration_bounds = array<i64: 1, 1>, scalar_prefetch = 0 : i64, scratch_operands = 1 : i64, tpu.core_type = #tpu.core_type<tc>, window_params = [{transform_indices = @transform_0, window_bounds = array<i64: 16, 128>}, {transform_indices = @transform_1, window_bounds = array<i64: 16, 128>}, {transform_indices = @transform_2, window_bounds = array<i64: 8, 128>}]} {
    %c0_i32 = arith.constant 0 : i32
    %0 = arith.cmpi eq, %arg1, %c0_i32 : i32
    %1 = arith.extui %0 : i1 to i32
    %c0_i32_0 = arith.constant 0 : i32
    %2 = arith.cmpi ne, %1, %c0_i32_0 : i32
    scf.if %2 {
      %cst_18 = arith.constant 0.000000e+00 : f32
      %42 = vector.broadcast %cst_18 : f32 to vector<16x128xf32>
      %c0_19 = arith.constant 0 : index
      %c0_20 = arith.constant 0 : index
      %43 = vector.load %arg5[%c0_19, %c0_20] : memref<16x128xf32, #tpu.memory_space<vmem>>, vector<16x128xf32>
      tpu.vector_store %arg5[%c0_19, %c0_20], %42 {strides = array<i32>} : memref<16x128xf32, #tpu.memory_space<vmem>>, vector<16x128xf32>,
    } else {
    }
    %c0 = arith.constant 0 : index
    %c0_1 = arith.constant 0 : index
    %3 = vector.load %arg2[%c0, %c0_1] : memref<16x128xf32, #tpu.memory_space<vmem>>, vector<16x128xf32>
    %c0_2 = arith.constant 0 : index
    %c0_3 = arith.constant 0 : index
    %4 = vector.load %arg3[%c0_2, %c0_3] : memref<16x128xf32, #tpu.memory_space<vmem>>, vector<16x128xf32>
    %5 = math.absf %3 : vector<16x128xf32>
    %cst = arith.constant 0.000000e+00 : f32
    %6 = vector.broadcast %cst : f32 to vector<16x128xf32>
    %7 = arith.subf %6, %5 : vector<16x128xf32>
    %8 = math.exp %7 : vector<16x128xf32>
    %cst_4 = arith.constant 0.000000e+00 : f32
    %9 = vector.broadcast %cst_4 : f32 to vector<16x128xf32>
    %10 = arith.maximumf %3, %9 : vector<16x128xf32>
    %11 = arith.mulf %3, %4 : vector<16x128xf32>
    %12 = arith.subf %10, %11 : vector<16x128xf32>
    %13 = math.log1p %8 : vector<16x128xf32>
    %14 = arith.addf %12, %13 : vector<16x128xf32>
    %cst_5 = arith.constant 1.000000e+00 : f32
    %15 = vector.broadcast %cst_5 : f32 to vector<16x128xf32>
    %16 = arith.addf %15, %8 : vector<16x128xf32>
    %17 = tpu.reciprocal %16 {approx = true} : vector<16x128xf32> -> vector<16x128xf32>
    %18 = arith.mulf %16, %17 : vector<16x128xf32>
    %cst_6 = arith.constant 2.000000e+00 : f32
    %19 = vector.broadcast %cst_6 : f32 to vector<16x128xf32>
    %20 = arith.subf %19, %18 : vector<16x128xf32>
    %21 = arith.mulf %17, %20 : vector<16x128xf32>
    %cst_7 = arith.constant 0.000000e+00 : f32
    %22 = vector.broadcast %cst_7 : f32 to vector<16x128xf32>
    %23 = arith.cmpf ogt, %3, %22 : vector<16x128xf32>
    %cst_8 = arith.constant 5.000000e-01 : f32
    %24 = vector.broadcast %cst_8 : f32 to vector<16x128xf32>
    %25 = arith.cmpf ogt, %4, %24 : vector<16x128xf32>
    %26 = arith.xori %23, %25 : vector<16x128xi1>
    %cst_9 = arith.constant 1.000000e+00 : f32
    %27 = vector.broadcast %cst_9 : f32 to vector<16x128xf32>
    %28 = arith.select %26, %8, %27 : vector<16x128xi1>, vector<16x128xf32>
    %29 = arith.mulf %28, %21 : vector<16x128xf32>
    %cst_10 = arith.constant 1.00000095 : f32
    %30 = vector.broadcast %cst_10 : f32 to vector<16x128xf32>
    %31 = arith.subf %30, %29 : vector<16x128xf32>
    %cst_11 = arith.constant 0.000000e+00 : f32
    %32 = vector.broadcast %cst_11 : f32 to vector<16x128xf32>
    %33 = arith.maximumf %31, %32 : vector<16x128xf32>
    %34 = math.sqrt %33 : vector<16x128xf32>
    %35 = arith.mulf %14, %34 : vector<16x128xf32>
    %c0_12 = arith.constant 0 : index
    %c0_13 = arith.constant 0 : index
    %36 = vector.load %arg5[%c0_12, %c0_13] : memref<16x128xf32, #tpu.memory_space<vmem>>, vector<16x128xf32>
    %37 = arith.addf %36, %35 : vector<16x128xf32>
    %c0_14 = arith.constant 0 : index
    %c0_15 = arith.constant 0 : index
    %38 = vector.load %arg5[%c0_14, %c0_15] : memref<16x128xf32, #tpu.memory_space<vmem>>, vector<16x128xf32>
    tpu.vector_store %arg5[%c0_14, %c0_15], %37 {strides = array<i32>} : memref<16x128xf32, #tpu.memory_space<vmem>>, vector<16x128xf32>,
    %c0_i32_16 = arith.constant 0 : i32
    %39 = arith.cmpi eq, %arg1, %c0_i32_16 : i32
    %40 = arith.extui %39 : i1 to i32
    %c0_i32_17 = arith.constant 0 : i32
    %41 = arith.cmpi ne, %40, %c0_i32_17 : i32
    scf.if %41 {
      %c0_18 = arith.constant 0 : index
      %c0_19 = arith.constant 0 : index
      %42 = vector.load %arg5[%c0_18, %c0_19] : memref<16x128xf32, #tpu.memory_space<vmem>>, vector<16x128xf32>
      %43 = vector.shape_cast %42 : vector<16x128xf32> to vector<2x8x128xf32>
      %cst_20 = arith.constant dense<0.000000e+00> : vector<8x128xf32>
      %44 = vector.multi_reduction <add>, %43, %cst_20 [0] : vector<2x8x128xf32> to vector<8x128xf32>
      %c0_21 = arith.constant 0 : index
      %c0_22 = arith.constant 0 : index
      %45 = vector.load %arg4[%c0_21, %c0_22] : memref<8x128xf32, #tpu.memory_space<vmem>>, vector<8x128xf32>
      tpu.vector_store %arg4[%c0_21, %c0_22], %44 {strides = array<i32>} : memref<8x128xf32, #tpu.memory_space<vmem>>, vector<8x128xf32>,
    } else {
    }
    return
  }
  func.func @transform_0(%arg0: i32, %arg1: i32) -> (i32, i32) {
    %c1_i32 = arith.constant 1 : i32
    %0 = arith.muli %arg0, %c1_i32 : i32
    %1 = arith.addi %0, %arg1 : i32
    %c0_i32 = arith.constant 0 : i32
    %c0_i32_0 = arith.constant 0 : i32
    return %1, %c0_i32 : i32, i32
  }
  func.func @transform_1(%arg0: i32, %arg1: i32) -> (i32, i32) {
    %c1_i32 = arith.constant 1 : i32
    %0 = arith.muli %arg0, %c1_i32 : i32
    %1 = arith.addi %0, %arg1 : i32
    %c0_i32 = arith.constant 0 : i32
    %c0_i32_0 = arith.constant 0 : i32
    return %1, %c0_i32 : i32, i32
  }
  func.func @transform_2(%arg0: i32, %arg1: i32) -> (i32, i32) {
    %c0_i32 = arith.constant 0 : i32
    %c0_i32_0 = arith.constant 0 : i32
    return %arg0, %c0_i32 : i32, i32
  }
}

</mosaic_0001>

<bundles_post_ra>
// kernel: focal_loss.1
= control target key start
LH: loop header
LB: loop body
LE: loop exit
PB: predicated region body
PF: predicated region fallthrough
CT: control target
= control target key end

     0   :  { %s226_s0 = inlined_call_operand.vmem [shape: f32[16,128], index: 0, kind: input, shape index: {}]   ;;  %s227_s1 = inlined_call_operand.vmem [shape: f32[16,128], index: 1, kind: input, shape index: {}]   ;;  %s228_s2 = inlined_call_operand.vmem [shape: f32[8,128], index: 2, kind: output, shape index: {}]  }
   0x1   :  { %v202_v0 = vld [vmem:[%s226_s0] sm:$0xff]  ;;  %v207_v1 = vld [vmem:[%s226_s0 + $0x8] sm:$0xff] }
   0x2   :  { %v65_v2 = vand.u32 2147483647, %v202_v0  ;;  %v66_v3 = vand.u32 2147483647, %v207_v1  ;;  %v63_v12 = vld [vmem:[%s227_s1] sm:$0xff]  ;;  %v64_v13 = vld [vmem:[%s227_s1 + $0x8] sm:$0xff] }
   0x3   :  { %vm109_vm0 = vcmp.gt.f32.partialorder %v202_v0, 0.0  ;;  %vm111_vm1 = vcmp.gt.f32.partialorder %v63_v12, 0.5  ;;  %vm110_vm2 = vcmp.gt.f32.partialorder %v207_v1, 0.0  ;;  %vm112_vm3 = vcmp.gt.f32.partialorder %v64_v13, 0.5 }
   0x4   :  { %v67_v4 = vsub.f32 0.0, %v65_v2  ;;  %v68_v5 = vsub.f32 0.0, %v66_v3  ;;  %vm113_vm4 = vmxor %vm109_vm0, %vm111_vm1  ;;  %v73_v37 = vmax.f32 %v202_v0, 0.0  ;;  %v75_v38 = vmul.f32 %v63_v12, %v202_v0 }
   0x5   :  { %vm114_vm5 = vmxor %vm110_vm2, %vm112_vm3  ;;  %v74_v42 = vmax.f32 %v207_v1, 0.0  ;;  %v76_v43 = vmul.f32 %v64_v13, %v207_v1 }
   0x6   :  { %v69_v6 = vmul.f32 1.442695, %v67_v4  ;;  %v71_v7 = vmul.f32 1.442695, %v68_v5  ;;  %v77_v46 = vsub.f32 %v73_v37, %v75_v38 }
   0x7   :  { %v78_v48 = vsub.f32 %v74_v42, %v76_v43 }
   0x8   :  { %168 = vpow2.f32 %v69_v6 }
   0x9   :  { %170 = vpow2.f32 %v71_v7 }
  0x12   :  { %v169_v8 = vpop.eup %168 }
  0x13   :  { %v171_v9 = vpop.eup %170  ;;  %v79_v10 = vadd.f32 1.0, %v169_v8  ;;  %v115_v20 = vsel %vm113_vm4, %v169_v8, 1.0  ;;  %v82_v25 = vmul.f32 -0.5, %v169_v8  ;;  %v85_v34 = vand.u32 2147483647, %v169_v8 }
  0x14   :  { %v88_v11 = vadd.f32 1.0, %v171_v9  ;;  %v116_v22 = vsel %vm114_vm5, %v171_v9, 1.0  ;;  %v91_v28 = vmul.f32 -0.5, %v171_v9  ;;  %v94_v39 = vand.u32 2147483647, %v171_v9 }
  0x15   :  { %172 = vrcp.f32 %v79_v10  ;;  %v83_v31 = vadd.f32 1.0, %v82_v25  ;;  %vm86_vm6 = vcmp.lt.f32.partialorder %v85_v34, 0.0004427343 }
  0x16   :  { %174 = vrcp.f32 %v88_v11  ;;  %v92_v35 = vadd.f32 1.0, %v91_v28  ;;  %vm95_vm7 = vcmp.lt.f32.partialorder %v94_v39, 0.0004427343 }
  0x17   :  { %176 = vlog2.f32 %v79_v10  ;;  %v84_v41 = vmul.f32 %v169_v8, %v83_v31 }
  0x18   :  { %178 = vlog2.f32 %v88_v11  ;;  %v93_v45 = vmul.f32 %v171_v9, %v92_v35 }
  0x1f   :  { %v173_v14 = vpop.eup %172 }
  0x20   :  { %v175_v15 = vpop.eup %174  ;;  %v103_v16 = vmul.f32 %v173_v14, %v79_v10 }
  0x21   :  { %v104_v17 = vmul.f32 %v175_v15, %v88_v11  ;;  %v177_v33 = vpop.eup %176 }
  0x22   :  { %v105_v18 = vsub.f32 2.0, %v103_v16  ;;  %v179_v36 = vpop.eup %178  ;;  %v81_v40 = vmul.f32 0.6931472, %v177_v33 }
  0x23   :  { %v106_v19 = vsub.f32 2.0, %v104_v17  ;;  %v90_v44 = vmul.f32 0.6931472, %v179_v36 }
  0x24   :  { %v107_v21 = vmul.f32 %v173_v14, %v105_v18  ;;  %v87_v47 = vsel %vm86_vm6, %v84_v41, %v81_v40 }
  0x25   :  { %v108_v23 = vmul.f32 %v175_v15, %v106_v19  ;;  %v96_v49 = vsel %vm95_vm7, %v93_v45, %v90_v44  ;;  %v97_v51 = vadd.f32 %v87_v47, %v77_v46 }
  0x26   :  { %v117_v24 = vmul.f32 %v115_v20, %v107_v21  ;;  %v98_v56 = vadd.f32 %v96_v49, %v78_v48 }
  0x27   :  { %v118_v26 = vmul.f32 %v116_v22, %v108_v23 }
  0x28   :  { %v119_v27 = vsub.f32 1.000001, %v117_v24 }
  0x29   :  { %v120_v29 = vsub.f32 1.000001, %v118_v26 }
  0x2a   :  { %v121_v30 = vmax.f32 %v119_v27, 0.0 }
  0x2b   :  { %v122_v32 = vmax.f32 %v120_v29, 0.0 }
  0x2c   :  { %180 = vrsqrt.f32 %v121_v30  ;;  %vm125_vm8 = vcmp.eq.f32.partialorder %v121_v30, inf  ;;  %v128_v52 = vand.u32 2147483648, %v121_v30  ;;  %vm127_vm9 = vcmp.eq.f32.partialorder %v121_v30, 0.0 }
  0x2d   :  { %182 = vrsqrt.f32 %v122_v32  ;;  %vm132_vm10 = vcmp.eq.f32.partialorder %v122_v32, inf  ;;  %v135_v55 = vand.u32 2147483648, %v122_v32  ;;  %vm134_vm11 = vcmp.eq.f32.partialorder %v122_v32, 0.0 }
  0x36   :  { %v181_v50 = vpop.eup %180 }
  0x37   :  { %v183_v53 = vpop.eup %182  ;;  %v124_v54 = vmul.f32 %v181_v50, %v121_v30 }
  0x38   :  { %v131_v57 = vmul.f32 %v183_v53, %v122_v32 }
  0x39   :  { %v126_v58 = vsel %vm125_vm8, %v121_v30, %v124_v54 }
  0x3a   :  { %v129_v59 = vsel %vm127_vm9, %v128_v52, %v126_v58  ;;  %v133_v60 = vsel %vm132_vm10, %v122_v32, %v131_v57 }
  0x3b   :  { %v136_v61 = vsel %vm134_vm11, %v135_v55, %v133_v60  ;;  %v137_v62 = vmul.f32 %v129_v59, %v97_v51 }
  0x3c   :  { %v138_v63 = vmul.f32 %v136_v61, %v98_v56 }
  0x3e   :  { %v150_v0 = vadd.f32 %v138_v63, %v137_v62 }
  0x40   :  { %151 = vst [vmem:[%s228_s2] sm:$0xff] %v150_v0 }

</bundles_post_ra>
